<compile_context>
chip_gen: v5e
topology: v5e:2x2
jax: 0.10.0
libtpu: 0.0.40
codegen_flags: <defaults>
</compile_context>

<pallas_src>
import jax
import jax.numpy as jnp
from jax.experimental import pallas as pl
from jax.experimental.pallas import tpu as pltpu

BN_EPS = 1e-5


def _make_residual_block_kernel(N, C, L, precision):
    """Build the fused kernel for static shapes (N, C, L)."""
    NL = N * L
    inv_cnt = 1.0 / float(NL)

    def kernel(x_ref, w1_ref, w2_ref, p_ref, o_ref):
        # x_ref/o_ref : (C, N*L) f32 lane-dense slab; sample n occupies columns [nL,(n+1)L)
        # w*_ref      : (3, C, C) f32 ; tap k pairs with x[l + k - 1]
        # p_ref       : (C, 4)  f32  ; columns [g1, be1, g2, be2]
        x = x_ref[...]                                                # (C, NL)

        # Sample-seam masks, built once from a lane iota (independent of N).
        col = jax.lax.broadcasted_iota(jnp.int32, (C, NL), 1)
        lpos = col % L
        at_first = lpos == 0
        at_last = lpos == (L - 1)

        def conv(h, w_ref):
            # k=3 taps via XLU rolls + one vselect each; three K=C MXU dots, no stacked temp.
            h_prev = jnp.where(at_first, 0.0, pltpu.roll(h, shift=1, axis=1))
            h_next = jnp.where(at_last, 0.0, pltpu.roll(h, shift=NL - 1, axis=1))
            dot = lambda w, a: jnp.dot(w, a, preferred_element_type=jnp.float32,
                                       precision=precision)
            # Conv bias omitted: cancelled exactly by the training-mode BN mean subtraction.
            return dot(w_ref[0], h_prev) + dot(w_ref[1], h) + dot(w_ref[2], h_next)

        def bn(y, gamma, beta, relu):
            # Training-mode BN per channel over (batch, length); biased, centered variance.
            mean = jnp.sum(y, axis=1, keepdims=True) * inv_cnt        # (C, 1)
            cen = y - mean
            var = jnp.sum(cen * cen, axis=1, keepdims=True) * inv_cnt  # (C, 1)
            z = cen * (gamma * jax.lax.rsqrt(var + BN_EPS)) + beta
            return jnp.maximum(z, 0.0) if relu else z

        p = p_ref[...]                                                # (C, 4)
        g1, be1, g2, be2 = p[:, 0:1], p[:, 1:2], p[:, 2:3], p[:, 3:4]

        h = bn(conv(x, w1_ref), g1, be1, relu=True)                   # (C, NL)
        z = bn(conv(h, w2_ref), g2, be2, relu=False)
        o_ref[...] = jnp.maximum(z + x, 0.0)                          # residual + ReLU

    return kernel


def residual_block(x, params, *, precision=jax.lax.Precision.HIGHEST):
    """x: (N, C, L) float32 in the PyTorch NCL layout. Returns (N, C, L) float32."""
    N, C, L = x.shape
    NL = N * L

    # Lane-dense slab: (N, C, L) -> (C, N*L).  Pure layout plumbing in the wrapper so the
    # kernel's loads/stores are unmasked full-lane accesses (review item 2, option (a)).
    x_slab = jnp.transpose(x, (1, 0, 2)).reshape(C, NL)

    # PyTorch Conv1d weight (O, I, K=3) -> (K, O, I); tap k hits x[l + k - 1].
    w1 = jnp.transpose(params["w1"], (2, 0, 1))
    w2 = jnp.transpose(params["w2"], (2, 0, 1))
    # Per-channel BN params packed as one (C, 4) input; conv biases intentionally omitted.
    pvec = jnp.stack([params["g1"], params["be1"], params["g2"], params["be2"]],
                     axis=1)                                          # (C, 4)

    # Generation-aware VMEM request: ~12 live slab-sized f32 temps + untiled I/O blocks,
    # capped at ~55% of this generation's physical VMEM (64 MiB on v7x, 128 MiB v5e/v6e).
    slab_bytes = C * NL * 4
    try:
        vmem_phys = int(pltpu.get_tpu_info().vmem_capacity_bytes)
    except Exception:  # no TPU info available at trace time: assume the smallest (v7x)
        vmem_phys = 64 * 2**20
    budget = (55 * vmem_phys) // 100
    need = 16 * slab_bytes + 2 * 4 * w1.size + 4 * pvec.size + (4 << 20)
    vmem_limit = int(min(budget, max(16 * 2**20, need)))
    # TODO(synk): when `need` exceeds `budget`, fall back to the gridded two-phase variant
    # instead of this single-block path (needed sooner on v7x's 64 MiB VMEM).

    vmem = pl.BlockSpec(memory_space=pltpu.MemorySpace.VMEM)
    kernel = _make_residual_block_kernel(N, C, L, precision)

    out_slab = pl.pallas_call(
        kernel,
        out_shape=jax.ShapeDtypeStruct((C, NL), jnp.float32),
        in_specs=[vmem, vmem, vmem, vmem],
        out_specs=vmem,
        # Output slab reuses the input slab's HBM buffer (same shape/dtype; x_slab is a
        # wrapper-local temp, so aliasing can never clobber the caller's array).
        input_output_aliases={0: 0},
        compiler_params=pltpu.CompilerParams(vmem_limit_bytes=vmem_limit),
    )(x_slab, w1, w2, pvec)

    return out_slab.reshape(C, N, L).transpose(1, 0, 2)


def reference_forward(x, p):
    """Pure-JAX reference mirroring the PyTorch module (training-mode BN, with biases)."""
    def conv(y, w, b):
        z = jax.lax.conv_general_dilated(
            y, w, window_strides=(1,), padding=((1, 1),),
            dimension_numbers=("NCH", "OIH", "NCH"),
            precision=jax.lax.Precision.HIGHEST)
        return z + b[None, :, None]

    def bn(y, g, b):
        mean = y.mean(axis=(0, 2), keepdims=True)
        var = ((y - mean) ** 2).mean(axis=(0, 2), keepdims=True)
        return g[None, :, None] * (y - mean) / jnp.sqrt(var + BN_EPS) + b[None, :, None]

    out = jax.nn.relu(bn(conv(x, p["w1"], p["b1"]), p["g1"], p["be1"]))
    out = bn(conv(out, p["w2"], p["b2"]), p["g2"], p["be2"])
    return jax.nn.relu(out + x)


def init_params(key, channels):
    ks = jax.random.split(key, 8)
    C = channels
    return {
        "w1": 0.2 * jax.random.normal(ks[0], (C, C, 3), jnp.float32),   # PyTorch OIH
        "b1": 0.1 * jax.random.normal(ks[1], (C,), jnp.float32),
        "g1": 1.0 + 0.1 * jax.random.normal(ks[2], (C,), jnp.float32),
        "be1": 0.1 * jax.random.normal(ks[3], (C,), jnp.float32),
        "w2": 0.2 * jax.random.normal(ks[4], (C, C, 3), jnp.float32),
        "b2": 0.1 * jax.random.normal(ks[5], (C,), jnp.float32),
        "g2": 1.0 + 0.1 * jax.random.normal(ks[6], (C,), jnp.float32),
        "be2": 0.1 * jax.random.normal(ks[7], (C,), jnp.float32),
    }


if __name__ == "__main__":
    N, C, L = 2, 8, 128
    root = jax.random.PRNGKey(0)
    k_x, k_p = jax.random.split(root)
    x = jax.random.normal(k_x, (N, C, L), jnp.float32)
    params = init_params(k_p, C)

    ref = reference_forward(x, params)

    out = jax.block_until_ready(residual_block(x, params))
    assert out.shape == (N, C, L) and out.dtype == jnp.float32
    assert jnp.allclose(out, ref, atol=1e-3, rtol=1e-3), (
        f"max abs err {float(jnp.max(jnp.abs(out - ref)))}")

    # Review item: matmul-precision knob.  DEFAULT (single-pass bf16 MXU) is the large-C
    # throughput setting; exercised here to show it compiles and runs.  At C=8 the kernel
    # is copy/VPU-bound, so HIGHEST stays the asserted default for the 1e-3 tolerance.
    jax.block_until_ready(residual_block(x, params,
                                         precision=jax.lax.Precision.DEFAULT))

    print("KERNEL_OK")
</pallas_src>

<mosaic_0001>
module attributes {stable_mosaic.version = 11 : i64} {
  func.func @kernel(%arg0: memref<8x256xf32, #tpu.memory_space<vmem>>, %arg1: memref<3x8x8xf32, #tpu.memory_space<vmem>>, %arg2: memref<3x8x8xf32, #tpu.memory_space<vmem>>, %arg3: memref<8x4xf32, #tpu.memory_space<vmem>>, %arg4: memref<8x256xf32, #tpu.memory_space<vmem>>) attributes {dimension_semantics = [], scalar_prefetch = 0 : i64, scratch_operands = 0 : i64, tpu.core_type = #tpu.core_type<tc>} {
    %c0 = arith.constant 0 : index
    %c0_0 = arith.constant 0 : index
    %0 = vector.load %arg0[%c0, %c0_0] : memref<8x256xf32, #tpu.memory_space<vmem>>, vector<8x256xf32>
    %1 = tpu.iota {dimensions = array<i32: 1>} : vector<8x256xi32>
    %c128_i32 = arith.constant 128 : i32
    %c0_i32 = arith.constant 0 : i32
    %2 = arith.cmpi eq, %c128_i32, %c0_i32 : i32
    %c1_i32 = arith.constant 1 : i32
    %3 = arith.select %2, %c1_i32, %c128_i32 : i32
    %4 = vector.broadcast %3 : i32 to vector<8x256xi32>
    %5 = arith.remsi %1, %4 : vector<8x256xi32>
    %c0_i32_1 = arith.constant 0 : i32
    %6 = vector.broadcast %c0_i32_1 : i32 to vector<8x256xi32>
    %7 = arith.cmpi ne, %5, %6 : vector<8x256xi32>
    %c0_i32_2 = arith.constant 0 : i32
    %8 = vector.broadcast %c0_i32_2 : i32 to vector<8x256xi32>
    %9 = arith.cmpi slt, %5, %8 : vector<8x256xi32>
    %c0_i32_3 = arith.constant 0 : i32
    %10 = arith.cmpi slt, %3, %c0_i32_3 : i32
    %11 = vector.broadcast %10 : i1 to vector<8x256xi1>
    %12 = vector.broadcast %11 : vector<8x256xi1> to vector<8x256xi1>
    %13 = arith.xori %9, %12 : vector<8x256xi1>
    %14 = arith.andi %13, %7 : vector<8x256xi1>
    %15 = vector.broadcast %3 : i32 to vector<8x256xi32>
    %16 = arith.addi %5, %15 : vector<8x256xi32>
    %17 = arith.select %14, %16, %5 : vector<8x256xi1>, vector<8x256xi32>
    %c0_i32_4 = arith.constant 0 : i32
    %18 = vector.broadcast %c0_i32_4 : i32 to vector<8x256xi32>
    %19 = arith.cmpi eq, %17, %18 : vector<8x256xi32>
    %c127_i32 = arith.constant 127 : i32
    %20 = vector.broadcast %c127_i32 : i32 to vector<8x256xi32>
    %21 = arith.cmpi eq, %17, %20 : vector<8x256xi32>
    %c0_5 = arith.constant 0 : index
    %c0_6 = arith.constant 0 : index
    %22 = vector.load %arg3[%c0_5, %c0_6] : memref<8x4xf32, #tpu.memory_space<vmem>>, vector<8x4xf32>
    %23 = vector.extract_strided_slice %22 {offsets = [0, 0], sizes = [8, 1], strides = [1, 1]} : vector<8x4xf32> to vector<8x1xf32>
    %24 = vector.extract_strided_slice %22 {offsets = [0, 1], sizes = [8, 1], strides = [1, 1]} : vector<8x4xf32> to vector<8x1xf32>
    %25 = vector.extract_strided_slice %22 {offsets = [0, 2], sizes = [8, 1], strides = [1, 1]} : vector<8x4xf32> to vector<8x1xf32>
    %26 = vector.extract_strided_slice %22 {offsets = [0, 3], sizes = [8, 1], strides = [1, 1]} : vector<8x4xf32> to vector<8x1xf32>
    %c1_i32_7 = arith.constant 1 : i32
    %27 = tpu.dynamic_rotate %0 by %c1_i32_7 dim 1 : vector<8x256xf32>, i32 -> vector<8x256xf32>
    %cst = arith.constant 0.000000e+00 : f32
    %28 = vector.broadcast %cst : f32 to vector<8x256xf32>
    %29 = arith.select %19, %28, %27 : vector<8x256xi1>, vector<8x256xf32>
    %c255_i32 = arith.constant 255 : i32
    %30 = tpu.dynamic_rotate %0 by %c255_i32 dim 1 : vector<8x256xf32>, i32 -> vector<8x256xf32>
    %cst_8 = arith.constant 0.000000e+00 : f32
    %31 = vector.broadcast %cst_8 : f32 to vector<8x256xf32>
    %32 = arith.select %21, %31, %30 : vector<8x256xi1>, vector<8x256xf32>
    %c0_9 = arith.constant 0 : index
    %c0_10 = arith.constant 0 : index
    %c0_11 = arith.constant 0 : index
    %33 = vector.load %arg1[%c0_9, %c0_10, %c0_11] : memref<3x8x8xf32, #tpu.memory_space<vmem>>, vector<1x8x8xf32>
    %34 = vector.shape_cast %33 : vector<1x8x8xf32> to vector<8x8xf32>
    %cst_12 = arith.constant dense<0.000000e+00> : vector<8x256xf32>
    %35 = tpu.matmul %34, %29, %cst_12 {dimension_numbers = #tpu.dot_dimension_numbers<[1], [0], [0], [1], [0, 0, 1, 1], [], []>, precision = #tpu.contract_precision<fp32>} : vector<8x8xf32>, vector<8x256xf32>, vector<8x256xf32> -> vector<8x256xf32>
    %c1 = arith.constant 1 : index
    %c0_13 = arith.constant 0 : index
    %c0_14 = arith.constant 0 : index
    %36 = vector.load %arg1[%c1, %c0_13, %c0_14] : memref<3x8x8xf32, #tpu.memory_space<vmem>>, vector<1x8x8xf32>
    %37 = vector.shape_cast %36 : vector<1x8x8xf32> to vector<8x8xf32>
    %cst_15 = arith.constant dense<0.000000e+00> : vector<8x256xf32>
    %38 = tpu.matmul %37, %0, %cst_15 {dimension_numbers = #tpu.dot_dimension_numbers<[1], [0], [0], [1], [0, 0, 1, 1], [], []>, precision = #tpu.contract_precision<fp32>} : vector<8x8xf32>, vector<8x256xf32>, vector<8x256xf32> -> vector<8x256xf32>
    %39 = arith.addf %35, %38 : vector<8x256xf32>
    %c2 = arith.constant 2 : index
    %c0_16 = arith.constant 0 : index
    %c0_17 = arith.constant 0 : index
    %40 = vector.load %arg1[%c2, %c0_16, %c0_17] : memref<3x8x8xf32, #tpu.memory_space<vmem>>, vector<1x8x8xf32>
    %41 = vector.shape_cast %40 : vector<1x8x8xf32> to vector<8x8xf32>
    %cst_18 = arith.constant dense<0.000000e+00> : vector<8x256xf32>
    %42 = tpu.matmul %41, %32, %cst_18 {dimension_numbers = #tpu.dot_dimension_numbers<[1], [0], [0], [1], [0, 0, 1, 1], [], []>, precision = #tpu.contract_precision<fp32>} : vector<8x8xf32>, vector<8x256xf32>, vector<8x256xf32> -> vector<8x256xf32>
    %43 = arith.addf %39, %42 : vector<8x256xf32>
    %cst_19 = arith.constant dense<0.000000e+00> : vector<8xf32>
    %44 = vector.multi_reduction <add>, %43, %cst_19 [1] : vector<8x256xf32> to vector<8xf32>
    %45 = vector.shape_cast %44 : vector<8xf32> to vector<8x1xf32>
    %cst_20 = arith.constant 3.906250e-03 : f32
    %46 = vector.broadcast %cst_20 : f32 to vector<8x1xf32>
    %47 = arith.mulf %45, %46 : vector<8x1xf32>
    %48 = vector.broadcast %47 : vector<8x1xf32> to vector<8x256xf32>
    %49 = arith.subf %43, %48 : vector<8x256xf32>
    %50 = arith.mulf %49, %49 : vector<8x256xf32>
    %cst_21 = arith.constant dense<0.000000e+00> : vector<8xf32>
    %51 = vector.multi_reduction <add>, %50, %cst_21 [1] : vector<8x256xf32> to vector<8xf32>
    %52 = vector.shape_cast %51 : vector<8xf32> to vector<8x1xf32>
    %cst_22 = arith.constant 3.906250e-03 : f32
    %53 = vector.broadcast %cst_22 : f32 to vector<8x1xf32>
    %54 = arith.mulf %52, %53 : vector<8x1xf32>
    %cst_23 = arith.constant 9.99999974E-6 : f32
    %55 = vector.broadcast %cst_23 : f32 to vector<8x1xf32>
    %56 = arith.addf %54, %55 : vector<8x1xf32>
    %57 = math.rsqrt %56 : vector<8x1xf32>
    %58 = arith.mulf %23, %57 : vector<8x1xf32>
    %59 = vector.broadcast %58 : vector<8x1xf32> to vector<8x256xf32>
    %60 = arith.mulf %49, %59 : vector<8x256xf32>
    %61 = vector.broadcast %24 : vector<8x1xf32> to vector<8x256xf32>
    %62 = arith.addf %60, %61 : vector<8x256xf32>
    %cst_24 = arith.constant 0.000000e+00 : f32
    %63 = vector.broadcast %cst_24 : f32 to vector<8x256xf32>
    %64 = arith.maximumf %62, %63 : vector<8x256xf32>
    %c1_i32_25 = arith.constant 1 : i32
    %65 = tpu.dynamic_rotate %64 by %c1_i32_25 dim 1 : vector<8x256xf32>, i32 -> vector<8x256xf32>
    %cst_26 = arith.constant 0.000000e+00 : f32
    %66 = vector.broadcast %cst_26 : f32 to vector<8x256xf32>
    %67 = arith.select %19, %66, %65 : vector<8x256xi1>, vector<8x256xf32>
    %c255_i32_27 = arith.constant 255 : i32
    %68 = tpu.dynamic_rotate %64 by %c255_i32_27 dim 1 : vector<8x256xf32>, i32 -> vector<8x256xf32>
    %cst_28 = arith.constant 0.000000e+00 : f32
    %69 = vector.broadcast %cst_28 : f32 to vector<8x256xf32>
    %70 = arith.select %21, %69, %68 : vector<8x256xi1>, vector<8x256xf32>
    %c0_29 = arith.constant 0 : index
    %c0_30 = arith.constant 0 : index
    %c0_31 = arith.constant 0 : index
    %71 = vector.load %arg2[%c0_29, %c0_30, %c0_31] : memref<3x8x8xf32, #tpu.memory_space<vmem>>, vector<1x8x8xf32>
    %72 = vector.shape_cast %71 : vector<1x8x8xf32> to vector<8x8xf32>
    %cst_32 = arith.constant dense<0.000000e+00> : vector<8x256xf32>
    %73 = tpu.matmul %72, %67, %cst_32 {dimension_numbers = #tpu.dot_dimension_numbers<[1], [0], [0], [1], [0, 0, 1, 1], [], []>, precision = #tpu.contract_precision<fp32>} : vector<8x8xf32>, vector<8x256xf32>, vector<8x256xf32> -> vector<8x256xf32>
    %c1_33 = arith.constant 1 : index
    %c0_34 = arith.constant 0 : index
    %c0_35 = arith.constant 0 : index
    %74 = vector.load %arg2[%c1_33, %c0_34, %c0_35] : memref<3x8x8xf32, #tpu.memory_space<vmem>>, vector<1x8x8xf32>
    %75 = vector.shape_cast %74 : vector<1x8x8xf32> to vector<8x8xf32>
    %cst_36 = arith.constant dense<0.000000e+00> : vector<8x256xf32>
    %76 = tpu.matmul %75, %64, %cst_36 {dimension_numbers = #tpu.dot_dimension_numbers<[1], [0], [0], [1], [0, 0, 1, 1], [], []>, precision = #tpu.contract_precision<fp32>} : vector<8x8xf32>, vector<8x256xf32>, vector<8x256xf32> -> vector<8x256xf32>
    %77 = arith.addf %73, %76 : vector<8x256xf32>
    %c2_37 = arith.constant 2 : index
    %c0_38 = arith.constant 0 : index
    %c0_39 = arith.constant 0 : index
    %78 = vector.load %arg2[%c2_37, %c0_38, %c0_39] : memref<3x8x8xf32, #tpu.memory_space<vmem>>, vector<1x8x8xf32>
    %79 = vector.shape_cast %78 : vector<1x8x8xf32> to vector<8x8xf32>
    %cst_40 = arith.constant dense<0.000000e+00> : vector<8x256xf32>
    %80 = tpu.matmul %79, %70, %cst_40 {dimension_numbers = #tpu.dot_dimension_numbers<[1], [0], [0], [1], [0, 0, 1, 1], [], []>, precision = #tpu.contract_precision<fp32>} : vector<8x8xf32>, vector<8x256xf32>, vector<8x256xf32> -> vector<8x256xf32>
    %81 = arith.addf %77, %80 : vector<8x256xf32>
    %cst_41 = arith.constant dense<0.000000e+00> : vector<8xf32>
    %82 = vector.multi_reduction <add>, %81, %cst_41 [1] : vector<8x256xf32> to vector<8xf32>
    %83 = vector.shape_cast %82 : vector<8xf32> to vector<8x1xf32>
    %cst_42 = arith.constant 3.906250e-03 : f32
    %84 = vector.broadcast %cst_42 : f32 to vector<8x1xf32>
    %85 = arith.mulf %83, %84 : vector<8x1xf32>
    %86 = vector.broadcast %85 : vector<8x1xf32> to vector<8x256xf32>
    %87 = arith.subf %81, %86 : vector<8x256xf32>
    %88 = arith.mulf %87, %87 : vector<8x256xf32>
    %cst_43 = arith.constant dense<0.000000e+00> : vector<8xf32>
    %89 = vector.multi_reduction <add>, %88, %cst_43 [1] : vector<8x256xf32> to vector<8xf32>
    %90 = vector.shape_cast %89 : vector<8xf32> to vector<8x1xf32>
    %cst_44 = arith.constant 3.906250e-03 : f32
    %91 = vector.broadcast %cst_44 : f32 to vector<8x1xf32>
    %92 = arith.mulf %90, %91 : vector<8x1xf32>
    %cst_45 = arith.constant 9.99999974E-6 : f32
    %93 = vector.broadcast %cst_45 : f32 to vector<8x1xf32>
    %94 = arith.addf %92, %93 : vector<8x1xf32>
    %95 = math.rsqrt %94 : vector<8x1xf32>
    %96 = arith.mulf %25, %95 : vector<8x1xf32>
    %97 = vector.broadcast %96 : vector<8x1xf32> to vector<8x256xf32>
    %98 = arith.mulf %87, %97 : vector<8x256xf32>
    %99 = vector.broadcast %26 : vector<8x1xf32> to vector<8x256xf32>
    %100 = arith.addf %98, %99 : vector<8x256xf32>
    %101 = arith.addf %100, %0 : vector<8x256xf32>
    %cst_46 = arith.constant 0.000000e+00 : f32
    %102 = vector.broadcast %cst_46 : f32 to vector<8x256xf32>
    %103 = arith.maximumf %101, %102 : vector<8x256xf32>
    %c0_47 = arith.constant 0 : index
    %c0_48 = arith.constant 0 : index
    %104 = vector.load %arg4[%c0_47, %c0_48] : memref<8x256xf32, #tpu.memory_space<vmem>>, vector<8x256xf32>
    tpu.vector_store %arg4[%c0_47, %c0_48], %103 {strides = array<i32>} : memref<8x256xf32, #tpu.memory_space<vmem>>, vector<8x256xf32>,
    return
  }
}

</mosaic_0001>

<bundles_post_ra>
// kernel: tpu_custom_call.1
= control target key start
LH: loop header
LB: loop body
LE: loop exit
PB: predicated region body
PF: predicated region fallthrough
CT: control target
= control target key end

     0   :  { %9 = vsyncpa [#allocation3], 0  ;;  %s2286_s0 = inlined_call_operand.hbm [shape: f32[8,256], index: 0, kind: input, shape index: {}, may-alias: {0,4}]   ;;  %s2287_s1 = inlined_call_operand.vmem [shape: f32[3,8,8], index: 1, kind: input, shape index: {}]   ;;  %s2288_s2 = inlined_call_operand.hbm [shape: f32[3,8,8], index: 2, kind: input, shape index: {}]   ;;  %s2289_s3 = inlined_call_operand.vmem [shape: f32[8,4], index: 3, kind: input, shape index: {}]   ;;  %s2290_s4 = inlined_call_operand.hbm [shape: f32[8,256], index: 4, kind: output, shape index: {}, may-alias: {0,4}]  }
   0x1   :  { %10 = vsyncpa [#allocation6], 0 }
   0x2   :  { %11 = vsyncpa [#allocation4], 0  ;;  %s17_s17 = sshll.u32 %s2286_s0, 4  ;;  %s2102_s18 = smov [#allocation2]   ;;  %s18_s17 = int_to_ptr.hbm [resolvable:$true] %s17_s17 }
   0x3   :  { %s19_s19 = sshll.u32 %s2102_s18, 4  ;;  %s29_s22 = sshll.u32 %s2288_s2, 4  ;;  %s20_s19 = int_to_ptr.vmem [resolvable:$true] %s19_s19  ;;  %s30_s22 = int_to_ptr.hbm [resolvable:$true] %s29_s22 }
   0x4   :  { %22 = dma.hbm_to_vmem [thread:$0]  %s18_s17, 256, %s20_s19, [#allocation3]  }
   0x5   :  { %s2103_s23 = smov [#allocation5]   ;;  %s2104_s25 = smov 128  }
   0x6   :  { %s31_s24 = sshll.u32 %s2103_s23, 4  ;;  %s2105_s26 = smov 8   ;;  %s32_s24 = int_to_ptr.vmem [resolvable:$true] %s31_s24 }
   0x7   :  { %37 = dma.hbm_to_vmem [thread:$0]  %s30_s22, 384, %s32_s24, [#allocation6], %s2104_s25, %s2104_s25, %s2105_s26  }
   0x8   :  { %2096 = dma.done.wait [#allocation3], 256  }
   0x9   :  { %2097 = vsyncadd [#allocation3], 4294967040 }
   0xa   :  { %2098 = dma.done.wait [#allocation6], 384  }
   0xb   :  { %2099 = vsyncadd [#allocation6], 4294966912  ;;  %vm103_vm0 = vcmask 64512   ;;  %v2144_v0 = vld [vmem:[#allocation2] sm:$0xff]  ;;  %v2146_v1 = vld [vmem:[#allocation2 + $0x8] sm:$0xff]  ;;  %s2106_s2 = smov 1   ;;  %v50_v21 = vlaneseq }
   0xc   :  { %v2002_v2 = vld [vmem:[%s2287_s1 + $0x8] sm:$0xff]  ;;  %82 = vrot.lane.b32.xlu0 %v2144_v0, %s2106_s2  ;;  %v268_v3 = vand.u32 4294901760, %v2146_v1  ;;  %s2107_s28 = smov 127   ;;  %v122_v4 = vand.u32 4294901760, %v2144_v0  ;;  %v100_v19 = vld [vmem:[%s2287_s1] sm:$0xff]  ;;  %v2003_v48 = vld [vmem:[%s2287_s1 + $0x10] sm:$0xff] }
   0xd   :  { %91 = vrot.lane.b32.xlu1 %v2144_v0, %s2107_s28  ;;  %v105_v5 = vsel %vm103_vm0, %v2002_v2, 0  ;;  %v400_v20 = vsel %vm103_vm0, %v100_v19, 0  ;;  %v2170_v23 = vand.u32 127, %v50_v21  ;;  %v697_v53 = vsel %vm103_vm0, %v2003_v48, 0  ;;  %s1991_s11 = sshll.u32 %s2290_s4, 4  ;;  %s1992_s11 = int_to_ptr.hbm [resolvable:$true] %s1991_s11 }
   0xe   :  { %v124_v6 = vand.u32 4294901760, %v105_v5  ;;  %123 = vmatpush.msra.mxu0 %v122_v4  ;;  %199 = vmatpush.msra.mxu3 %v122_v4  ;;  %v149_v7 = vsub.f32 %v2144_v0, %v122_v4  ;;  %v295_v8 = vsub.f32 %v2146_v1, %v268_v3  ;;  %v2168_v22 = vand.u32 4294901760, %v400_v20 }
   0xf   :  { %v52_v25 = vadd.s32 128, %v2170_v23  ;;  %vm86_vm1 = vcmp.lt.s32.totalorder %v2170_v23, 1  ;;  %vm95_vm2 = vcmp.lt.s32.totalorder %v2170_v23, 127  ;;  %vm77_vm3 = vcmp.eq.s32.totalorder %v2170_v23, 0 }
  0x10   :  { %v125_v9 = vsub.f32 %v105_v5, %v124_v6  ;;  %176 = vmatpush.msra.mxu2 %v149_v7  ;;  %v150_v10 = vand.u32 4294901760, %v149_v7  ;;  %v296_v11 = vand.u32 4294901760, %v295_v8  ;;  %v2173_v24 = vsub.f32 %v400_v20, %v2168_v22 }
  0x11   :  { %v64_v29 = vand.u32 127, %v52_v25  ;;  %vm79_vm5 = vcmp.eq.s32.totalorder %v2170_v23, 127  ;;  %v716_v58 = vand.u32 4294901760, %v697_v53 }
  0x12   :  { %v126_v12 = vand.u32 4294901760, %v125_v9  ;;  %179 = vmatmul.f32.vlgmr.msra.gmra.mxu2 %v125_v9  ;;  %v151_v13 = vsub.f32 %v149_v7, %v150_v10  ;;  %225 = vmatpush.msrb.mxu0 %v150_v10  ;;  %v297_v14 = vsub.f32 %v295_v8, %v296_v11  ;;  %v2177_v28 = vand.u32 4294901760, %v2173_v24 }
  0x13   :  { %269 = vmatpush.msrb.mxu2 %v268_v3  ;;  %vm2184_vm4 = vcmp.eq.s32.totalorder %v64_v29, 0  ;;  %vm2189_vm6 = vcmp.eq.s32.totalorder %v64_v29, 127  ;;  %v717_v63 = vsub.f32 %v697_v53, %v716_v58 }
  0x14   :  { %v127_v15 = vsub.f32 %v125_v9, %v126_v12  ;;  %203 = vmatmul.f32.vlgmr.msra.gmra.mxu3 %v126_v12  ;;  %84 = vrot.lane.b32.xlu0 %v2146_v1, %s2106_s2  ;;  %v152_v16 = vand.u32 4294901760, %v151_v13  ;;  %v298_v17 = vand.u32 4294901760, %v297_v14  ;;  %v422_v30 = vsub.f32 %v2173_v24, %v2177_v28 }
  0x15   :  { %371 = vmatpush.msra.mxu2 %v296_v11  ;;  %93 = vrot.lane.b32.xlu1 %v2146_v1, %s2107_s28 }
  0x16   :  { %v128_v18 = vand.u32 4294901760, %v127_v15  ;;  %153 = vmatpush.msra.mxu1 %v152_v16  ;;  %299 = vmatpush.msrb.mxu3 %v298_v17  ;;  %v423_v34 = vand.u32 4294901760, %v422_v30 }
  0x17   :  { %155 = vmatmul.f32.vlgmr.msra.gmra.mxu1 %v124_v6 }
  0x18   :  { %129 = vmatmul.f32.vlgmr.msra.gmra.mxu0 %v128_v18  ;;  %247 = vmatpush.msrb.mxu1 %v122_v4  ;;  %v718_v4 = vand.u32 4294901760, %v717_v63 }
  0x19   :  { %322 = vmatpush.msra.mxu0 %v295_v8  ;;  %393 = vmatpush.msra.mxu3 %v268_v3 }
  0x1a   :  { %275 = vmatmul.f32.vlgmr.msrb.gmra.mxu2 %v128_v18  ;;  %345 = vmatpush.msra.mxu1 %v268_v3  ;;  %v719_v7 = vsub.f32 %v717_v63, %v718_v4 }
  0x1c   :  { %301 = vmatmul.f32.vlgmr.msrb.gmra.mxu3 %v124_v6  ;;  %v720_v8 = vand.u32 4294901760, %v719_v7 }
  0x1f   :  { %249 = vmatmul.f32.vlgmr.msrb.gmra.mxu1 %v124_v6 }
  0x20   :  { %227 = vmatmul.f32.vlgmr.msrb.gmra.mxu0 %v124_v6 }
  0x22   :  { %373 = vmatmul.f32.vlgmr.msra.gmra.mxu2 %v124_v6 }
  0x24   :  { %395 = vmatmul.f32.vlgmr.msra.gmra.mxu3 %v124_v6 }
  0x27   :  { %349 = vmatmul.f32.vlgmr.msra.gmra.mxu1 %v126_v12 }
  0x28   :  { %325 = vmatmul.f32.vlgmr.msra.gmra.mxu0 %v125_v9 }
  0x7e   :  { %v83_v26 = vpop.permute.xlu0 %82 }
  0x7f   :  { %v92_v27 = vpop.permute.xlu1 %91 }
  0x86   :  { %v85_v33 = vpop.permute.xlu0 %84 }
  0x87   :  { %v94_v35 = vpop.permute.xlu1 %93  ;;  %v87_v36 = vsel %vm86_vm1, %v83_v26, %v85_v33  ;;  %v88_v37 = vsel %vm86_vm1, %v85_v33, %v83_v26 }
  0x88   :  { %v96_v38 = vsel %vm95_vm2, %v92_v27, %v94_v35  ;;  %v97_v39 = vsel %vm95_vm2, %v94_v35, %v92_v27  ;;  %v89_v40 = vsel %vm77_vm3, 0.0, %v88_v37  ;;  %v90_v41 = vsel %vm2184_vm4, 0.0, %v87_v36 }
  0x89   :  { %v98_v42 = vsel %vm79_vm5, 0.0, %v96_v38  ;;  %v99_v43 = vsel %vm2189_vm6, 0.0, %v97_v39  ;;  %v417_v44 = vand.u32 4294901760, %v89_v40  ;;  %v563_v45 = vand.u32 4294901760, %v90_v41 }
  0x8a   :  { %v714_v46 = vand.u32 4294901760, %v98_v42  ;;  %v2209_v47 = vand.u32 4294901760, %v99_v43 }
  0x8b   :  { %v444_v49 = vsub.f32 %v89_v40, %v417_v44  ;;  %v590_v50 = vsub.f32 %v90_v41, %v563_v45  ;;  %418 = vmatpush.msrb.mxu0 %v417_v44  ;;  %494 = vmatpush.msrb.mxu3 %v417_v44 }
  0x8c   :  { %424 = vmatmul.f32.vlgmr.msrb.gmra.mxu0 %v423_v34  ;;  %498 = vmatmul.f32.vlgmr.msrb.gmra.mxu3 %v2177_v28  ;;  %v741_v54 = vsub.f32 %v98_v42, %v714_v46  ;;  %v887_v55 = vsub.f32 %v99_v43, %v2209_v47 }
  0x8d   :  { %471 = vmatpush.msrb.mxu2 %v444_v49  ;;  %v445_v51 = vand.u32 4294901760, %v444_v49  ;;  %v591_v52 = vand.u32 4294901760, %v590_v50 }
  0x8e   :  { %474 = vmatmul.f32.vlgmr.msrb.gmra.mxu2 %v2173_v24  ;;  %v888_v61 = vand.u32 4294901760, %v887_v55  ;;  %v742_v62 = vand.u32 4294901760, %v741_v54 }
  0x8f   :  { %564 = vmatpush.msra.mxu2 %v563_v45  ;;  %520 = vmatpush.msra.mxu0 %v445_v51  ;;  %v446_v56 = vsub.f32 %v444_v49, %v445_v51  ;;  %v592_v57 = vsub.f32 %v590_v50, %v591_v52 }
  0x90   :  { %v743_v2 = vsub.f32 %v741_v54, %v742_v62  ;;  %v889_v3 = vsub.f32 %v887_v55, %v888_v61 }
  0x91   :  { %666 = vmatpush.msrb.mxu2 %v591_v52  ;;  %617 = vmatpush.msrb.mxu0 %v590_v50  ;;  %v447_v59 = vand.u32 4294901760, %v446_v56  ;;  %v593_v60 = vand.u32 4294901760, %v592_v57 }
  0x92   :  { %v744_v5 = vand.u32 4294901760, %v743_v2  ;;  %v890_v6 = vand.u32 4294901760, %v889_v3 }
  0x93   :  { %448 = vmatpush.msrb.mxu1 %v447_v59  ;;  %594 = vmatpush.msra.mxu3 %v593_v60 }
  0x94   :  { %450 = vmatmul.f32.vlgmr.msrb.gmra.mxu1 %v2168_v22  ;;  %522 = vmatmul.f32.vlgmr.msra.gmra.mxu0 %v2168_v22  ;;  %v156_v12 = vpop.f32.mrf.mxu1 }
  0x95   :  { %542 = vmatpush.msra.mxu1 %v417_v44  ;;  %596 = vmatmul.f32.vlgmr.msra.gmra.mxu3 %v2168_v22  ;;  %v130_v9 = vpop.f32.mrf.mxu0  ;;  %v180_v11 = vpop.f32.mrf.mxu2 }
  0x96   :  { %688 = vmatpush.msrb.mxu3 %v563_v45  ;;  %570 = vmatmul.f32.vlgmr.msra.gmra.mxu2 %v423_v34  ;;  %v157_v29 = vadd.f32 %v156_v12, %v130_v9 }
  0x97   :  { %640 = vmatpush.msrb.mxu1 %v563_v45  ;;  %715 = vmatpush.msra.mxu0 %v714_v46  ;;  %v204_v10 = vpop.f32.mrf.mxu3 }
  0x98   :  { %768 = vmatpush.msra.mxu2 %v741_v54  ;;  %791 = vmatpush.msra.mxu3 %v714_v46  ;;  %v181_v35 = vadd.f32 %v180_v11, %v157_v29 }
  0x9a   :  { %v205_v39 = vadd.f32 %v204_v10, %v181_v35 }
  0x9c   :  { %544 = vmatmul.f32.vlgmr.msra.gmra.mxu1 %v2168_v22  ;;  %620 = vmatmul.f32.vlgmr.msrb.gmra.mxu0 %v2173_v24  ;;  %v250_v16 = vpop.f32.mrf.mxu1 }
  0x9d   :  { %690 = vmatmul.f32.vlgmr.msrb.gmra.mxu3 %v2168_v22  ;;  %817 = vmatpush.msrb.mxu0 %v742_v62  ;;  %v228_v13 = vpop.f32.mrf.mxu0  ;;  %v276_v15 = vpop.f32.mrf.mxu2 }
  0x9e   :  { %745 = vmatpush.msra.mxu1 %v744_v5  ;;  %891 = vmatpush.msrb.mxu3 %v890_v6  ;;  %v229_v43 = vadd.f32 %v228_v13, %v205_v39 }
  0x9f   :  { %668 = vmatmul.f32.vlgmr.msrb.gmra.mxu2 %v2168_v22  ;;  %v302_v14 = vpop.f32.mrf.mxu3 }
  0xa0   :  { %861 = vmatpush.msrb.mxu2 %v2209_v47  ;;  %v303_v30 = vadd.f32 %v302_v14, %v276_v15 }
  0xa4   :  { %644 = vmatmul.f32.vlgmr.msrb.gmra.mxu1 %v2177_v28  ;;  %721 = vmatmul.f32.vlgmr.msra.gmra.mxu0 %v720_v8  ;;  %v350_v20 = vpop.f32.mrf.mxu1 }
  0xa5   :  { %795 = vmatmul.f32.vlgmr.msra.gmra.mxu3 %v718_v4  ;;  %839 = vmatpush.msrb.mxu1 %v714_v46  ;;  %v326_v17 = vpop.f32.mrf.mxu0  ;;  %v374_v19 = vpop.f32.mrf.mxu2 }
  0xa6   :  { %914 = vmatpush.msra.mxu0 %v887_v55  ;;  %985 = vmatpush.msra.mxu3 %v2209_v47  ;;  %v327_v36 = vadd.f32 %v326_v17, %v303_v30  ;;  %v2108_v30 = vmov 0  }
  0xa7   :  { %771 = vmatmul.f32.vlgmr.msra.gmra.mxu2 %v717_v63  ;;  %v396_v18 = vpop.f32.mrf.mxu3  ;;  %2015 = vset.pattern.permute.xlu0 %v2108_v30 }
  0xa8   :  { %963 = vmatpush.msra.mxu2 %v888_v61  ;;  %v351_v40 = vadd.f32 %v350_v20, %v327_v36 }
  0xaa   :  { %v375_v44 = vadd.f32 %v374_v19, %v351_v40 }
  0xac   :  { %747 = vmatmul.f32.vlgmr.msra.gmra.mxu1 %v716_v58  ;;  %819 = vmatmul.f32.vlgmr.msrb.gmra.mxu0 %v716_v58  ;;  %v397_v48 = vadd.f32 %v396_v18, %v375_v44 }
  0xad   :  { %937 = vmatpush.msra.mxu1 %v2209_v47  ;;  %893 = vmatmul.f32.vlgmr.msrb.gmra.mxu3 %v716_v58  ;;  %v251_v47 = vadd.f32 %v250_v16, %v229_v43 }
  0xaf   :  { %867 = vmatmul.f32.vlgmr.msrb.gmra.mxu2 %v720_v8 }
  0xb4   :  { %841 = vmatmul.f32.vlgmr.msrb.gmra.mxu1 %v716_v58  ;;  %917 = vmatmul.f32.vlgmr.msra.gmra.mxu0 %v717_v63 }
  0xb5   :  { %987 = vmatmul.f32.vlgmr.msra.gmra.mxu3 %v716_v58 }
  0xb7   :  { %965 = vmatmul.f32.vlgmr.msra.gmra.mxu2 %v716_v58 }
  0xbc   :  { %941 = vmatmul.f32.vlgmr.msra.gmra.mxu1 %v718_v4 }
 0x109   :  { %v425_v21 = vpop.f32.mrf.mxu0 }
 0x10a   :  { %v426_v51 = vadd.f32 %v425_v21, %v251_v47 }
 0x10f   :  { %v499_v22 = vpop.f32.mrf.mxu3 }
 0x111   :  { %v451_v24 = vpop.f32.mrf.mxu1  ;;  %v475_v25 = vpop.f32.mrf.mxu2 }
 0x112   :  { %v523_v26 = vpop.f32.mrf.mxu0  ;;  %v452_v54 = vadd.f32 %v451_v24, %v426_v51 }
 0x114   :  { %v476_v59 = vadd.f32 %v475_v25, %v452_v54 }
 0x116   :  { %v500_v3 = vadd.f32 %v499_v22, %v476_v59 }
 0x118   :  { %v597_v27 = vpop.f32.mrf.mxu3  ;;  %v524_v8 = vadd.f32 %v523_v26, %v500_v3 }
 0x119   :  { %v545_v28 = vpop.f32.mrf.mxu1  ;;  %v571_v33 = vpop.f32.mrf.mxu2 }
 0x11a   :  { %v621_v34 = vpop.f32.mrf.mxu0  ;;  %v572_v52 = vadd.f32 %v571_v33, %v397_v48  ;;  %v546_v15 = vadd.f32 %v545_v28, %v524_v8  ;;  %v2232_v28 = vld [vmem:[%s2289_s3] sm:$0xff]  ;;  %v2109_v33 = vmov 1   ;;  %v1049_v8 = vld [vmem:[#allocation5] sm:$0xff]  ;;  %s2112_s3 = smov [#allocation7]  }
 0x11b   :  { %2016 = vset.pattern.permute.xlu1 %v2109_v33  ;;  %s1989_s8 = sshll.u32 %s2112_s3, 4  ;;  %s1990_s8 = int_to_ptr.vmem [resolvable:$true] %s1989_s8 }
 0x11c   :  { %v598_v55 = vadd.f32 %v597_v27, %v572_v52  ;;  %1026 = vperm.xlu1 %2016, %v2232_v28  }
 0x11e   :  { %v622_v61 = vadd.f32 %v621_v34, %v598_v55 }
 0x120   :  { %v691_v37 = vpop.f32.mrf.mxu3 }
 0x121   :  { %v645_v38 = vpop.f32.mrf.mxu1 }
 0x122   :  { %v669_v41 = vpop.f32.mrf.mxu2  ;;  %v722_v42 = vpop.f32.mrf.mxu0  ;;  %v646_v4 = vadd.f32 %v645_v38, %v622_v61 }
 0x124   :  { %v670_v9 = vadd.f32 %v669_v41, %v646_v4 }
 0x126   :  { %v692_v16 = vadd.f32 %v691_v37, %v670_v9  ;;  %v1348_v9 = vsel %vm103_vm0, %v1049_v8, 0 }
 0x128   :  { %v796_v45 = vpop.f32.mrf.mxu3 }
 0x129   :  { %v748_v46 = vpop.f32.mrf.mxu1 }
 0x12a   :  { %v772_v49 = vpop.f32.mrf.mxu2  ;;  %v820_v50 = vpop.f32.mrf.mxu0  ;;  %v749_v53 = vadd.f32 %v748_v46, %v722_v42 }
 0x12c   :  { %v773_v56 = vadd.f32 %v772_v49, %v749_v53 }
 0x12e   :  { %v797_v62 = vadd.f32 %v796_v45, %v773_v56  ;;  %v1051_v45 = vld [vmem:[#allocation5 + $0x8] sm:$0xff] }
 0x12f   :  { %v1053_v46 = vsel %vm103_vm0, %v1051_v45, 0 }
 0x130   :  { %v894_v58 = vpop.f32.mrf.mxu3  ;;  %v821_v5 = vadd.f32 %v820_v50, %v797_v62  ;;  %v1072_v47 = vand.u32 4294901760, %v1053_v46 }
 0x131   :  { %v842_v57 = vpop.f32.mrf.mxu1 }
 0x132   :  { %v868_v60 = vpop.f32.mrf.mxu2  ;;  %v918_v2 = vpop.f32.mrf.mxu0  ;;  %v843_v13 = vadd.f32 %v842_v57, %v821_v5  ;;  %v1073_v48 = vsub.f32 %v1053_v46, %v1072_v47 }
 0x133   :  { %v895_v63 = vadd.f32 %v894_v58, %v868_v60 }
 0x134   :  { %v991_v18 = vadd.f32 %v843_v13, %v546_v15  ;;  %v1074_v49 = vand.u32 4294901760, %v1073_v48 }
 0x135   :  { %v919_v6 = vadd.f32 %v918_v2, %v895_v63 }
 0x136   :  { %v1075_v54 = vsub.f32 %v1073_v48, %v1074_v49 }
 0x138   :  { %v988_v12 = vpop.f32.mrf.mxu3  ;;  %v1076_v59 = vand.u32 4294901760, %v1075_v54 }
 0x139   :  { %v942_v7 = vpop.f32.mrf.mxu1 }
 0x13a   :  { %v943_v10 = vadd.f32 %v942_v7, %v919_v6  ;;  %v966_v11 = vpop.f32.mrf.mxu2 }
 0x13c   :  { %v967_v14 = vadd.f32 %v966_v11, %v943_v10  ;;  %v2242_v10 = vand.u32 4294901760, %v1348_v9 }
 0x13e   :  { %v989_v17 = vadd.f32 %v988_v12, %v967_v14  ;;  %v2245_v11 = vsub.f32 %v1348_v9, %v2242_v10 }
 0x140   :  { %v992_v19 = vadd.f32 %v989_v17, %v692_v16  ;;  %v2248_v12 = vand.u32 4294901760, %v2245_v11 }
 0x142   :  { %v993_v20 = vadd.f32 %v992_v19, %v991_v18  ;;  %v1370_v13 = vsub.f32 %v2245_v11, %v2248_v12 }
 0x144   :  { %994 = vadd.xlane.f32.xlu2 %v993_v20  ;;  %v1371_v20 = vand.u32 4294901760, %v1370_v13 }
 0x18e   :  { %v1027_v51 = vpop.permute.xlu1 %1026 }
 0x1b7   :  { %v995_v21 = vpop.xlane.xlu2 %994 }
 0x1b8   :  { %v996_v22 = vmul.f32 0.00390625, %v995_v21 }
 0x1ba   :  { %v997_v24 = vsub.f32 %v991_v18, %v996_v22  ;;  %v998_v25 = vsub.f32 %v992_v19, %v996_v22 }
 0x1bc   :  { %v999_v27 = vmul.f32 %v997_v24, %v997_v24  ;;  %v1000_v29 = vmul.f32 %v998_v25, %v998_v25 }
 0x1be   :  { %v1001_v26 = vadd.f32 %v1000_v29, %v999_v27  ;;  %v1643_v27 = vld [vmem:[#allocation5 + $0x10] sm:$0xff] }
 0x1bf   :  { %v1645_v31 = vsel %vm103_vm0, %v1643_v27, 0 }
 0x1c0   :  { %1002 = vadd.xlane.f32.xlu2 %v1001_v26 }
 0x233   :  { %v1003_v34 = vpop.xlane.xlu2 %1002 }
 0x234   :  { %v1004_v35 = vmul.f32 0.00390625, %v1003_v34 }
 0x236   :  { %v1005_v36 = vadd.f32 1e-05, %v1004_v35 }
 0x238   :  { %2020 = vrsqrt.f32 %v1005_v36  ;;  %vm1012_vm8 = vweird.f32 %v1005_v36 }
 0x23e   :  { %v2021_v37 = vpop.eup %2020 }
 0x23f   :  { %v1007_v38 = vmul.f32 %v2021_v37, %v1005_v36  ;;  %vm1013_vm7 = vweird.f32 %v2021_v37 }
 0x240   :  { %vm1014_vm9 = vmor %vm1012_vm8, %vm1013_vm7 }
 0x241   :  { %v1008_v39 = vmul.f32 %v2021_v37, %v1007_v38 }
 0x243   :  { %v1009_v40 = vmul.f32 0.5, %v1008_v39 }
 0x245   :  { %v1010_v41 = vsub.f32 1.5, %v1009_v40 }
 0x247   :  { %v1011_v42 = vmul.f32 %v2021_v37, %v1010_v41 }
 0x249   :  { %v1015_v43 = vsel %vm1014_vm9, %v2021_v37, %v1011_v42 }
 0x24a   :  { %v1016_v44 = vmul.f32 %v1015_v43, %v2232_v28  ;;  %v1664_v43 = vand.u32 4294901760, %v1645_v31 }
 0x24c   :  { %1019 = vperm.xlu0 %2015, %v1016_v44   ;;  %v1665_v32 = vsub.f32 %v1645_v31, %v1664_v43 }
 0x2be   :  { %v1020_v50 = vpop.permute.xlu0 %1019 }
 0x2bf   :  { %v1022_v52 = vmul.f32 %v1020_v50, %v997_v24  ;;  %v1023_v53 = vmul.f32 %v1020_v50, %v998_v25 }
 0x2c1   :  { %v1029_v55 = vadd.f32 %v1027_v51, %v1022_v52  ;;  %v1030_v56 = vadd.f32 %v1027_v51, %v1023_v53  ;;  %v1666_v51 = vand.u32 4294901760, %v1665_v32 }
 0x2c3   :  { %v1031_v57 = vmax.f32 %v1029_v55, 0.0  ;;  %v1032_v58 = vmax.f32 %v1030_v56, 0.0  ;;  %v1667_v53 = vsub.f32 %v1665_v32, %v1666_v51 }
 0x2c5   :  { %1035 = vrot.lane.b32.xlu1 %v1032_v58, %s2106_s2  ;;  %1041 = vrot.lane.b32.xlu0 %v1031_v57, %s2107_s28  ;;  %v1070_v60 = vand.u32 4294901760, %v1031_v57  ;;  %v1216_v61 = vand.u32 4294901760, %v1032_v58  ;;  %v1668_v54 = vand.u32 4294901760, %v1667_v53 }
 0x2c6   :  { %1033 = vrot.lane.b32.xlu2 %v1031_v57, %s2106_s2 }
 0x2c7   :  { %1071 = vmatpush.msrb.mxu0 %v1070_v60  ;;  %1147 = vmatpush.msrb.mxu3 %v1070_v60  ;;  %v1097_v62 = vsub.f32 %v1031_v57, %v1070_v60  ;;  %v1243_v63 = vsub.f32 %v1032_v58, %v1216_v61 }
 0x2c8   :  { %1077 = vmatmul.f32.vlgmr.msrb.gmra.mxu0 %v1076_v59  ;;  %1151 = vmatmul.f32.vlgmr.msrb.gmra.mxu3 %v1074_v49 }
 0x2c9   :  { %1124 = vmatpush.msrb.mxu2 %v1097_v62  ;;  %v1098_v2 = vand.u32 4294901760, %v1097_v62  ;;  %v1244_v3 = vand.u32 4294901760, %v1243_v63 }
 0x2ca   :  { %1127 = vmatmul.f32.vlgmr.msrb.gmra.mxu2 %v1073_v48 }
 0x2cb   :  { %1217 = vmatpush.msra.mxu2 %v1216_v61  ;;  %1173 = vmatpush.msra.mxu0 %v1098_v2  ;;  %v1099_v4 = vsub.f32 %v1097_v62, %v1098_v2  ;;  %v1245_v5 = vsub.f32 %v1243_v63, %v1244_v3 }
 0x2cd   :  { %1319 = vmatpush.msrb.mxu2 %v1244_v3  ;;  %1270 = vmatpush.msrb.mxu0 %v1243_v63  ;;  %v1100_v6 = vand.u32 4294901760, %v1099_v4  ;;  %v1246_v7 = vand.u32 4294901760, %v1245_v5 }
 0x2ce   :  { %1043 = vrot.lane.b32.xlu1 %v1032_v58, %s2107_s28 }
 0x2cf   :  { %1101 = vmatpush.msrb.mxu1 %v1100_v6  ;;  %1247 = vmatpush.msra.mxu3 %v1246_v7 }
 0x2d0   :  { %1103 = vmatmul.f32.vlgmr.msrb.gmra.mxu1 %v1072_v47  ;;  %1175 = vmatmul.f32.vlgmr.msra.gmra.mxu0 %v1072_v47 }
 0x2d1   :  { %1195 = vmatpush.msra.mxu1 %v1070_v60  ;;  %1341 = vmatpush.msrb.mxu3 %v1216_v61 }
 0x2d2   :  { %1249 = vmatmul.f32.vlgmr.msra.gmra.mxu3 %v1072_v47  ;;  %1223 = vmatmul.f32.vlgmr.msra.gmra.mxu2 %v1076_v59 }
 0x2d3   :  { %1293 = vmatpush.msrb.mxu1 %v1216_v61 }
 0x2d8   :  { %1197 = vmatmul.f32.vlgmr.msra.gmra.mxu1 %v1072_v47  ;;  %1273 = vmatmul.f32.vlgmr.msrb.gmra.mxu0 %v1073_v48 }
 0x2da   :  { %1343 = vmatmul.f32.vlgmr.msrb.gmra.mxu3 %v1072_v47  ;;  %1321 = vmatmul.f32.vlgmr.msrb.gmra.mxu2 %v1072_v47 }
 0x2e0   :  { %1297 = vmatmul.f32.vlgmr.msrb.gmra.mxu1 %v1074_v49 }
 0x320   :  { %v1034_v14 = vpop.permute.xlu2 %1033 }
 0x337   :  { %v1036_v15 = vpop.permute.xlu1 %1035  ;;  %v1042_v30 = vpop.permute.xlu0 %1041 }
 0x338   :  { %v1037_v16 = vsel %vm86_vm1, %v1034_v14, %v1036_v15  ;;  %v1038_v17 = vsel %vm86_vm1, %v1036_v15, %v1034_v14 }
 0x339   :  { %v1039_v18 = vsel %vm77_vm3, 0.0, %v1038_v17  ;;  %v1040_v19 = vsel %vm2184_vm4, 0.0, %v1037_v16 }
 0x33a   :  { %v1365_v21 = vand.u32 4294901760, %v1039_v18  ;;  %v1511_v22 = vand.u32 4294901760, %v1040_v19 }
 0x33c   :  { %v1392_v24 = vsub.f32 %v1039_v18, %v1365_v21  ;;  %v1538_v25 = vsub.f32 %v1040_v19, %v1511_v22  ;;  %1366 = vmatpush.msra.mxu0 %v1365_v21  ;;  %1442 = vmatpush.msra.mxu3 %v1365_v21 }
 0x33d   :  { %1372 = vmatmul.f32.vlgmr.msra.gmra.mxu0 %v1371_v20  ;;  %1446 = vmatmul.f32.vlgmr.msra.gmra.mxu3 %v2248_v12 }
 0x33e   :  { %1419 = vmatpush.msra.mxu2 %v1392_v24  ;;  %v1393_v29 = vand.u32 4294901760, %v1392_v24  ;;  %v1539_v26 = vand.u32 4294901760, %v1538_v25 }
 0x33f   :  { %1422 = vmatmul.f32.vlgmr.msra.gmra.mxu2 %v2245_v11 }
 0x340   :  { %v1044_v33 = vpop.permute.xlu1 %1043  ;;  %1512 = vmatpush.msrb.mxu2 %v1511_v22  ;;  %1468 = vmatpush.msrb.mxu0 %v1393_v29  ;;  %v1394_v36 = vsub.f32 %v1392_v24, %v1393_v29  ;;  %v1540_v39 = vsub.f32 %v1538_v25, %v1539_v26 }
 0x341   :  { %v1045_v34 = vsel %vm95_vm2, %v1042_v30, %v1044_v33  ;;  %v1046_v35 = vsel %vm95_vm2, %v1044_v33, %v1042_v30 }
 0x342   :  { %v1047_v37 = vsel %vm79_vm5, 0.0, %v1045_v34  ;;  %v1048_v38 = vsel %vm2189_vm6, 0.0, %v1046_v35  ;;  %1614 = vmatpush.msra.mxu2 %v1539_v26  ;;  %1565 = vmatpush.msra.mxu0 %v1538_v25  ;;  %v1395_v42 = vand.u32 4294901760, %v1394_v36  ;;  %v1541_v44 = vand.u32 4294901760, %v1540_v39 }
 0x343   :  { %v1662_v40 = vand.u32 4294901760, %v1047_v37  ;;  %v1808_v41 = vand.u32 4294901760, %v1048_v38 }
 0x344   :  { %1396 = vmatpush.msra.mxu1 %v1395_v42  ;;  %1542 = vmatpush.msrb.mxu3 %v1541_v44 }
 0x345   :  { %v1689_v45 = vsub.f32 %v1047_v37, %v1662_v40  ;;  %v1835_v46 = vsub.f32 %v1048_v38, %v1808_v41  ;;  %1398 = vmatmul.f32.vlgmr.msra.gmra.mxu1 %v2242_v10  ;;  %1470 = vmatmul.f32.vlgmr.msrb.gmra.mxu0 %v2242_v10  ;;  %v1078_v55 = vpop.f32.mrf.mxu0 }
 0x346   :  { %1490 = vmatpush.msrb.mxu1 %v1365_v21  ;;  %1544 = vmatmul.f32.vlgmr.msrb.gmra.mxu3 %v2242_v10 }
 0x347   :  { %v1690_v47 = vand.u32 4294901760, %v1689_v45  ;;  %v1836_v23 = vand.u32 4294901760, %v1835_v46  ;;  %1663 = vmatpush.msrb.mxu0 %v1662_v40  ;;  %1636 = vmatpush.msra.mxu3 %v1511_v22 }
 0x348   :  { %1588 = vmatpush.msra.mxu1 %v1511_v22  ;;  %1518 = vmatmul.f32.vlgmr.msrb.gmra.mxu2 %v1371_v20 }
 0x349   :  { %v1691_v48 = vsub.f32 %v1689_v45, %v1690_v47  ;;  %v1837_v49 = vsub.f32 %v1835_v46, %v1836_v23  ;;  %1739 = vmatpush.msrb.mxu3 %v1662_v40  ;;  %1716 = vmatpush.msrb.mxu2 %v1689_v45 }
 0x34b   :  { %v1692_v50 = vand.u32 4294901760, %v1691_v48  ;;  %v1838_v52 = vand.u32 4294901760, %v1837_v49  ;;  %v1152_v56 = vpop.f32.mrf.mxu3 }
 0x34d   :  { %1492 = vmatmul.f32.vlgmr.msrb.gmra.mxu1 %v2242_v10  ;;  %1568 = vmatmul.f32.vlgmr.msra.gmra.mxu0 %v2245_v11  ;;  %v1128_v57 = vpop.f32.mrf.mxu2  ;;  %v1104_v58 = vpop.f32.mrf.mxu1 }
 0x34e   :  { %1693 = vmatpush.msrb.mxu1 %v1692_v50  ;;  %1638 = vmatmul.f32.vlgmr.msra.gmra.mxu3 %v2242_v10  ;;  %v1176_v59 = vpop.f32.mrf.mxu0 }
 0x34f   :  { %1765 = vmatpush.msra.mxu0 %v1690_v47  ;;  %1839 = vmatpush.msra.mxu3 %v1838_v52 }
 0x350   :  { %1616 = vmatmul.f32.vlgmr.msra.gmra.mxu2 %v2242_v10 }
 0x351   :  { %1809 = vmatpush.msra.mxu2 %v1808_v41 }
 0x355   :  { %1592 = vmatmul.f32.vlgmr.msra.gmra.mxu1 %v2248_v12  ;;  %1669 = vmatmul.f32.vlgmr.msrb.gmra.mxu0 %v1668_v54  ;;  %v1250_v60 = vpop.f32.mrf.mxu3  ;;  %v1224_v61 = vpop.f32.mrf.mxu2  ;;  %v1105_v12 = vadd.f32 %v1104_v58, %v1078_v55 }
 0x356   :  { %1787 = vmatpush.msra.mxu1 %v1662_v40  ;;  %1743 = vmatmul.f32.vlgmr.msrb.gmra.mxu3 %v1666_v51  ;;  %v1198_v62 = vpop.f32.mrf.mxu1  ;;  %v1274_v63 = vpop.f32.mrf.mxu0  ;;  %v1251_v13 = vadd.f32 %v1250_v60, %v1224_v61 }
 0x357   :  { %1862 = vmatpush.msrb.mxu0 %v1835_v46  ;;  %1933 = vmatpush.msrb.mxu3 %v1808_v41  ;;  %v1129_v16 = vadd.f32 %v1128_v57, %v1105_v12  ;;  %v2111_v12 = vmov 3  }
 0x358   :  { %1719 = vmatmul.f32.vlgmr.msrb.gmra.mxu2 %v1665_v32  ;;  %v1275_v17 = vadd.f32 %v1274_v63, %v1251_v13  ;;  %2019 = vset.pattern.permute.xlu0 %v2111_v12 }
 0x359   :  { %1911 = vmatpush.msrb.mxu2 %v1836_v23  ;;  %v1153_v20 = vadd.f32 %v1152_v56, %v1129_v16 }
 0x35b   :  { %v1177_v25 = vadd.f32 %v1176_v59, %v1153_v20 }
 0x35d   :  { %1695 = vmatmul.f32.vlgmr.msrb.gmra.mxu1 %v1664_v43  ;;  %1767 = vmatmul.f32.vlgmr.msra.gmra.mxu0 %v1664_v43  ;;  %v1344_v2 = vpop.f32.mrf.mxu3  ;;  %v1322_v3 = vpop.f32.mrf.mxu2  ;;  %v1199_v30 = vadd.f32 %v1198_v62, %v1177_v25 }
 0x35e   :  { %1885 = vmatpush.msrb.mxu1 %v1808_v41  ;;  %1841 = vmatmul.f32.vlgmr.msra.gmra.mxu3 %v1664_v43  ;;  %v1298_v4 = vpop.f32.mrf.mxu1 }
 0x35f   :  { %v1299_v21 = vadd.f32 %v1298_v4, %v1275_v17 }
 0x360   :  { %1815 = vmatmul.f32.vlgmr.msra.gmra.mxu2 %v1668_v54 }
 0x361   :  { %v1323_v27 = vadd.f32 %v1322_v3, %v1299_v21 }
 0x363   :  { %v1345_v33 = vadd.f32 %v1344_v2, %v1323_v27 }
 0x365   :  { %1789 = vmatmul.f32.vlgmr.msra.gmra.mxu1 %v1664_v43  ;;  %1865 = vmatmul.f32.vlgmr.msrb.gmra.mxu0 %v1665_v32 }
 0x366   :  { %1935 = vmatmul.f32.vlgmr.msrb.gmra.mxu3 %v1664_v43 }
 0x368   :  { %1913 = vmatmul.f32.vlgmr.msrb.gmra.mxu2 %v1664_v43 }
 0x36d   :  { %1889 = vmatmul.f32.vlgmr.msrb.gmra.mxu1 %v1666_v51 }
 0x3ba   :  { %v1373_v5 = vpop.f32.mrf.mxu0 }
 0x3bb   :  { %v1374_v35 = vadd.f32 %v1373_v5, %v1199_v30 }
 0x3c0   :  { %v1447_v6 = vpop.f32.mrf.mxu3 }
 0x3c2   :  { %v1399_v7 = vpop.f32.mrf.mxu1  ;;  %v1423_v8 = vpop.f32.mrf.mxu2 }
 0x3c3   :  { %v1471_v9 = vpop.f32.mrf.mxu0  ;;  %v1400_v38 = vadd.f32 %v1399_v7, %v1374_v35 }
 0x3c5   :  { %v1424_v43 = vadd.f32 %v1423_v8, %v1400_v38 }
 0x3c7   :  { %v1448_v32 = vadd.f32 %v1447_v6, %v1424_v43 }
 0x3c9   :  { %v1545_v11 = vpop.f32.mrf.mxu3  ;;  %v1472_v52 = vadd.f32 %v1471_v9, %v1448_v32 }
 0x3ca   :  { %v1493_v10 = vpop.f32.mrf.mxu1 }
 0x3cb   :  { %v1569_v14 = vpop.f32.mrf.mxu0  ;;  %v1519_v15 = vpop.f32.mrf.mxu2  ;;  %v1494_v59 = vadd.f32 %v1493_v10, %v1472_v52 }
 0x3cc   :  { %v1520_v36 = vadd.f32 %v1519_v15, %v1345_v33 }
 0x3ce   :  { %v1546_v39 = vadd.f32 %v1545_v11, %v1520_v36  ;;  %v2110_v11 = vmov 2  }
 0x3cf   :  { %2017 = vset.pattern.permute.xlu2 %v2110_v11 }
 0x3d0   :  { %v1570_v45 = vadd.f32 %v1569_v14, %v1546_v39 }
 0x3d1   :  { %v1639_v19 = vpop.f32.mrf.mxu3 }
 0x3d2   :  { %v1593_v18 = vpop.f32.mrf.mxu1 }
 0x3d3   :  { %v1670_v22 = vpop.f32.mrf.mxu0  ;;  %v1617_v24 = vpop.f32.mrf.mxu2  ;;  %v1594_v48 = vadd.f32 %v1593_v18, %v1570_v45 }
 0x3d5   :  { %v1618_v53 = vadd.f32 %v1617_v24, %v1594_v48 }
 0x3d7   :  { %v1640_v60 = vadd.f32 %v1639_v19, %v1618_v53 }
 0x3d9   :  { %v1744_v26 = vpop.f32.mrf.mxu3 }
 0x3da   :  { %v1696_v29 = vpop.f32.mrf.mxu1 }
 0x3db   :  { %v1720_v31 = vpop.f32.mrf.mxu2  ;;  %v1768_v34 = vpop.f32.mrf.mxu0  ;;  %v1697_v37 = vadd.f32 %v1696_v29, %v1670_v22 }
 0x3dd   :  { %v1721_v40 = vadd.f32 %v1720_v31, %v1697_v37 }
 0x3df   :  { %v1745_v46 = vadd.f32 %v1744_v26, %v1721_v40 }
 0x3e1   :  { %v1842_v42 = vpop.f32.mrf.mxu3  ;;  %v1769_v49 = vadd.f32 %v1768_v34, %v1745_v46 }
 0x3e2   :  { %v1790_v41 = vpop.f32.mrf.mxu1 }
 0x3e3   :  { %v1816_v44 = vpop.f32.mrf.mxu2  ;;  %v1866_v23 = vpop.f32.mrf.mxu0  ;;  %v1791_v57 = vadd.f32 %v1790_v41, %v1769_v49 }
 0x3e4   :  { %v1843_v47 = vadd.f32 %v1842_v42, %v1816_v44 }
 0x3e5   :  { %v1939_v62 = vadd.f32 %v1791_v57, %v1494_v59 }
 0x3e6   :  { %v1867_v50 = vadd.f32 %v1866_v23, %v1843_v47 }
 0x3e9   :  { %v1936_v56 = vpop.f32.mrf.mxu3 }
 0x3ea   :  { %v1890_v51 = vpop.f32.mrf.mxu1 }
 0x3eb   :  { %v1891_v54 = vadd.f32 %v1890_v51, %v1867_v50  ;;  %v1914_v55 = vpop.f32.mrf.mxu2 }
 0x3ed   :  { %v1915_v58 = vadd.f32 %v1914_v55, %v1891_v54 }
 0x3ef   :  { %v1937_v61 = vadd.f32 %v1936_v56, %v1915_v58 }
 0x3f1   :  { %v1940_v63 = vadd.f32 %v1937_v61, %v1640_v60 }
 0x3f3   :  { %v1941_v2 = vadd.f32 %v1940_v63, %v1939_v62 }
 0x3f5   :  { %1942 = vadd.xlane.f32.xlu0 %v1941_v2 }
 0x468   :  { %v1943_v3 = vpop.xlane.xlu0 %1942 }
 0x469   :  { %v1944_v4 = vmul.f32 0.00390625, %v1943_v3 }
 0x46b   :  { %v1945_v5 = vsub.f32 %v1939_v62, %v1944_v4  ;;  %v1946_v6 = vsub.f32 %v1940_v63, %v1944_v4 }
 0x46d   :  { %v1947_v7 = vmul.f32 %v1945_v5, %v1945_v5  ;;  %v1948_v8 = vmul.f32 %v1946_v6, %v1946_v6 }
 0x46f   :  { %v1949_v9 = vadd.f32 %v1948_v8, %v1947_v7 }
 0x471   :  { %1950 = vadd.xlane.f32.xlu1 %v1949_v9 }
 0x4e4   :  { %v1951_v13 = vpop.xlane.xlu1 %1950 }
 0x4e5   :  { %v1952_v10 = vmul.f32 0.00390625, %v1951_v13 }
 0x4e7   :  { %v1953_v14 = vadd.f32 1e-05, %v1952_v10 }
 0x4e9   :  { %2022 = vrsqrt.f32 %v1953_v14  ;;  %vm1960_vm11 = vweird.f32 %v1953_v14 }
 0x4ef   :  { %v2023_v15 = vpop.eup %2022 }
 0x4f0   :  { %v1955_v16 = vmul.f32 %v2023_v15, %v1953_v14  ;;  %vm1961_vm10 = vweird.f32 %v2023_v15 }
 0x4f1   :  { %vm1962_vm12 = vmor %vm1960_vm11, %vm1961_vm10 }
 0x4f2   :  { %v1956_v17 = vmul.f32 %v2023_v15, %v1955_v16 }
 0x4f4   :  { %v1957_v18 = vmul.f32 0.5, %v1956_v17 }
 0x4f6   :  { %v1958_v19 = vsub.f32 1.5, %v1957_v18 }
 0x4f8   :  { %v1959_v20 = vmul.f32 %v2023_v15, %v1958_v19 }
 0x4fa   :  { %v1963_v21 = vsel %vm1962_vm12, %v2023_v15, %v1959_v20 }
 0x4fb   :  { %v1964_v22 = vmul.f32 %v1963_v21, %v2232_v28 }
 0x4fd   :  { %1967 = vperm.xlu2 %2017, %v1964_v22  }
 0x505   :  { %2018 = vset.pattern.permute.xlu2 %v2111_v12 }
 0x506   :  { %1973 = vperm.xlu2 %2018, %v2232_v28  }
 0x557   :  { %v1968_v24 = vpop.permute.xlu2 %1967 }
 0x558   :  { %v1970_v25 = vmul.f32 %v1968_v24, %v1945_v5  ;;  %v1971_v27 = vmul.f32 %v1968_v24, %v1946_v6 }
 0x560   :  { %v1974_v29 = vpop.permute.xlu2 %1973 }
 0x561   :  { %v1976_v26 = vadd.f32 %v1974_v29, %v1970_v25  ;;  %v1977_v30 = vadd.f32 %v1974_v29, %v1971_v27 }
 0x563   :  { %v1978_v33 = vadd.f32 %v1976_v26, %v2144_v0  ;;  %v1979_v31 = vadd.f32 %v1977_v30, %v2146_v1 }
 0x565   :  { %v1980_v34 = vmax.f32 %v1978_v33, 0.0  ;;  %v1981_v35 = vmax.f32 %v1979_v31, 0.0 }
 0x567   :  { %1982 = vst [vmem:[#allocation7] sm:$0xff] %v1980_v34 }
 0x568   :  { %1983 = vst [vmem:[#allocation7 + $0x8] sm:$0xff] %v1981_v35 }
 0x569   :  { %1994 = dma.vmem_to_hbm [thread:$0]  %s1990_s8, 256, %s1992_s11, [#allocation4]  }
 0x56a   :  { %2100 = dma.done.wait [#allocation4], 256  }
 0x56b   :  { %2101 = vsyncadd [#allocation4], 4294967040 }
 0x56c   :  { %1999 = vsyncpa [#allocation3], 1 }
 0x56d   :  { %2000 = vsyncpa [#allocation6], 1 }
 0x56e   :  { %2001 = vsyncpa [#allocation4], 1 }

</bundles_post_ra>
